<compile_context>
chip_gen: v5e
topology: v5e:2x2
jax: 0.10.0
libtpu: 0.0.40
codegen_flags: <defaults>
</compile_context>

<pallas_src>
import jax
import jax.numpy as jnp
from jax.experimental import pallas as pl
from jax.experimental.pallas import tpu as pltpu

CONCAT_NFRAMES = 11
INPUT_DIM = 39 * CONCAT_NFRAMES   # 429
OUTPUT_DIM = 64
BATCH = 512
BN_EPS = 1e-5
TM = 256                          # rows per grid step (fills the MXU on all gens)


def basic_block_kernel(x_ref, wt_ref, scale_ref, shift_ref, o_ref):
    # Linear (bias already folded into shift): (TM, Kp) @ (Kp, Cp) on the MXU,
    # f32 accumulation.
    y = jnp.dot(x_ref[...], wt_ref[...], preferred_element_type=jnp.float32)
    # Fused BatchNorm1d(eval) + bias affine, then ReLU — f32 epilogue on the VPU
    # (v5e has no bf16 VPU path), lane-dense (Cp=128k) store.
    o_ref[...] = jnp.maximum(y * scale_ref[...] + shift_ref[...], 0.0).astype(o_ref.dtype)


def basic_block_forward(x, weight, bias, gamma, beta, running_mean, running_var,
                        eps=BN_EPS, use_bf16=True, tm=TM):
    """Eval-mode BasicBlock forward.

    x: (N, D_in) float32; weight: (D_out, D_in) (PyTorch nn.Linear layout).
    Returns (N, D_out) float32.
    """
    n, d_in = x.shape
    d_out = weight.shape[0]

    # Aligned / padded dims.
    k_pad = ((d_in + 127) // 128) * 128          # 429 -> 512
    c_pad = max(((d_out + 127) // 128) * 128, 128)  # 64 -> 128
    n_pad = ((n + tm - 1) // tm) * tm

    # Fold BN running stats AND the Linear bias into one per-channel affine:
    #   out = (x @ W.T) * scale + shift
    inv_std = 1.0 / jnp.sqrt(running_var.astype(jnp.float32) + eps)
    scale = gamma.astype(jnp.float32) * inv_std
    shift = beta.astype(jnp.float32) + (bias.astype(jnp.float32)
                                        - running_mean.astype(jnp.float32)) * scale

    op_dtype = jnp.bfloat16 if use_bf16 else jnp.float32

    # Zero-pad (padding contributes exactly 0 to the contraction / extra lanes).
    xp = jnp.zeros((n_pad, k_pad), op_dtype).at[:n, :d_in].set(x.astype(op_dtype))
    wtp = jnp.zeros((k_pad, c_pad), op_dtype).at[:d_in, :d_out].set(
        weight.T.astype(op_dtype))
    scale_p = jnp.zeros((1, c_pad), jnp.float32).at[0, :d_out].set(scale)
    shift_p = jnp.zeros((1, c_pad), jnp.float32).at[0, :d_out].set(shift)

    out = pl.pallas_call(
        basic_block_kernel,
        out_shape=jax.ShapeDtypeStruct((n_pad, c_pad), jnp.float32),
        grid=(n_pad // tm,),
        in_specs=[
            pl.BlockSpec((tm, k_pad), lambda i: (i, 0)),      # streamed row tiles
            pl.BlockSpec((k_pad, c_pad), lambda i: (0, 0)),   # weights resident
            pl.BlockSpec((1, c_pad), lambda i: (0, 0)),       # scale resident
            pl.BlockSpec((1, c_pad), lambda i: (0, 0)),       # shift resident
        ],
        out_specs=pl.BlockSpec((tm, c_pad), lambda i: (i, 0)),
        compiler_params=pltpu.CompilerParams(
            dimension_semantics=("parallel",)),  # 2-TC sharding on v7x; no-op v5e/v6e
    )(xp, wtp, scale_p, shift_p)

    return out[:n, :d_out]


if __name__ == "__main__":
    key = jax.random.PRNGKey(0)
    kx, kw, kb, kg, kbe, km, kv = jax.random.split(key, 7)

    x = jax.random.normal(kx, (BATCH, INPUT_DIM), dtype=jnp.float32)

    # Deterministic parameter init (PyTorch shapes: Linear(D_in, D_out), BN1d(D_out)).
    limit = 1.0 / jnp.sqrt(jnp.float32(INPUT_DIM))
    weight = jax.random.uniform(kw, (OUTPUT_DIM, INPUT_DIM),
                                minval=-limit, maxval=limit, dtype=jnp.float32)
    bias = jax.random.uniform(kb, (OUTPUT_DIM,),
                              minval=-limit, maxval=limit, dtype=jnp.float32)
    gamma = 1.0 + 0.1 * jax.random.normal(kg, (OUTPUT_DIM,), dtype=jnp.float32)
    beta = 0.1 * jax.random.normal(kbe, (OUTPUT_DIM,), dtype=jnp.float32)
    running_mean = 0.1 * jax.random.normal(km, (OUTPUT_DIM,), dtype=jnp.float32)
    running_var = jnp.abs(1.0 + 0.1 * jax.random.normal(kv, (OUTPUT_DIM,),
                                                        dtype=jnp.float32))

    out = basic_block_forward(x, weight, bias, gamma, beta,
                              running_mean, running_var)
    out = jax.block_until_ready(out)

    # Reference (plain JAX, f32). Kernel uses bf16 matmul operands with f32
    # accumulation, so compare at a bf16-appropriate tolerance.
    inv_std = 1.0 / jnp.sqrt(running_var + BN_EPS)
    ref = jnp.maximum((x @ weight.T + bias - running_mean) * (gamma * inv_std) + beta,
                      0.0)
    assert out.shape == (BATCH, OUTPUT_DIM)
    assert jnp.allclose(out, ref, atol=2e-2, rtol=2e-2), float(
        jnp.max(jnp.abs(out - ref)))

    print("KERNEL_OK")
</pallas_src>

<mosaic_0001>
module attributes {stable_mosaic.version = 11 : i64} {
  func.func @basic_block_kernel(%arg0: i32, %arg1: memref<256x512xbf16, #tpu.memory_space<vmem>>, %arg2: memref<512x128xbf16, #tpu.memory_space<vmem>>, %arg3: memref<1x128xf32, #tpu.memory_space<vmem>>, %arg4: memref<1x128xf32, #tpu.memory_space<vmem>>, %arg5: memref<256x128xf32, #tpu.memory_space<vmem>>) attributes {dimension_semantics = [#tpu.dimension_semantics<parallel>], iteration_bounds = array<i64: 2>, scalar_prefetch = 0 : i64, scratch_operands = 0 : i64, tpu.core_type = #tpu.core_type<tc>, window_params = [{transform_indices = @transform_0, window_bounds = array<i64: 256, 512>}, {pipeline_mode = #tpu.pipeline_mode<synchronous>, transform_indices = @transform_1, window_bounds = array<i64: 512, 128>}, {pipeline_mode = #tpu.pipeline_mode<synchronous>, transform_indices = @transform_2, window_bounds = array<i64: 1, 128>}, {pipeline_mode = #tpu.pipeline_mode<synchronous>, transform_indices = @transform_3, window_bounds = array<i64: 1, 128>}, {transform_indices = @transform_4, window_bounds = array<i64: 256, 128>}]} {
    %c0 = arith.constant 0 : index
    %c0_0 = arith.constant 0 : index
    %0 = vector.load %arg1[%c0, %c0_0] : memref<256x512xbf16, #tpu.memory_space<vmem>>, vector<256x512xbf16>
    %c0_1 = arith.constant 0 : index
    %c0_2 = arith.constant 0 : index
    %1 = vector.load %arg2[%c0_1, %c0_2] : memref<512x128xbf16, #tpu.memory_space<vmem>>, vector<512x128xbf16>
    %cst = arith.constant dense<0.000000e+00> : vector<256x128xf32>
    %2 = tpu.matmul %0, %1, %cst {dimension_numbers = #tpu.dot_dimension_numbers<[1], [0], [0], [1], [0, 0, 1, 1], [], []>} : vector<256x512xbf16>, vector<512x128xbf16>, vector<256x128xf32> -> vector<256x128xf32>
    %c0_3 = arith.constant 0 : index
    %c0_4 = arith.constant 0 : index
    %3 = vector.load %arg3[%c0_3, %c0_4] : memref<1x128xf32, #tpu.memory_space<vmem>>, vector<1x128xf32>
    %4 = vector.broadcast %3 : vector<1x128xf32> to vector<256x128xf32>
    %5 = arith.mulf %2, %4 : vector<256x128xf32>
    %c0_5 = arith.constant 0 : index
    %c0_6 = arith.constant 0 : index
    %6 = vector.load %arg4[%c0_5, %c0_6] : memref<1x128xf32, #tpu.memory_space<vmem>>, vector<1x128xf32>
    %7 = vector.broadcast %6 : vector<1x128xf32> to vector<256x128xf32>
    %8 = arith.addf %5, %7 : vector<256x128xf32>
    %cst_7 = arith.constant 0.000000e+00 : f32
    %9 = vector.broadcast %cst_7 : f32 to vector<256x128xf32>
    %10 = arith.maximumf %8, %9 : vector<256x128xf32>
    %c0_8 = arith.constant 0 : index
    %c0_9 = arith.constant 0 : index
    %11 = vector.load %arg5[%c0_8, %c0_9] : memref<256x128xf32, #tpu.memory_space<vmem>>, vector<256x128xf32>
    tpu.vector_store %arg5[%c0_8, %c0_9], %10 {strides = array<i32>} : memref<256x128xf32, #tpu.memory_space<vmem>>, vector<256x128xf32>,
    return
  }
  func.func @transform_0(%arg0: i32) -> (i32, i32) {
    %c0_i32 = arith.constant 0 : i32
    %c0_i32_0 = arith.constant 0 : i32
    return %arg0, %c0_i32 : i32, i32
  }
  func.func @transform_1(%arg0: i32) -> (i32, i32) {
    %c0_i32 = arith.constant 0 : i32
    %c0_i32_0 = arith.constant 0 : i32
    %c0_i32_1 = arith.constant 0 : i32
    return %c0_i32, %c0_i32_0 : i32, i32
  }
  func.func @transform_2(%arg0: i32) -> (i32, i32) {
    %c0_i32 = arith.constant 0 : i32
    %c0_i32_0 = arith.constant 0 : i32
    %c0_i32_1 = arith.constant 0 : i32
    return %c0_i32, %c0_i32_0 : i32, i32
  }
  func.func @transform_3(%arg0: i32) -> (i32, i32) {
    %c0_i32 = arith.constant 0 : i32
    %c0_i32_0 = arith.constant 0 : i32
    %c0_i32_1 = arith.constant 0 : i32
    return %c0_i32, %c0_i32_0 : i32, i32
  }
  func.func @transform_4(%arg0: i32) -> (i32, i32) {
    %c0_i32 = arith.constant 0 : i32
    %c0_i32_0 = arith.constant 0 : i32
    return %arg0, %c0_i32 : i32, i32
  }
}

</mosaic_0001>

<bundles_post_ra>
// kernel: tpu_custom_call.1
= control target key start
LH: loop header
LB: loop body
LE: loop exit
PB: predicated region body
PF: predicated region fallthrough
CT: control target
= control target key end

     0   :  { %9 = vsyncpa [#allocation3], 0  ;;  %s2578_s0 = inlined_call_operand.hbm [shape: bf16[512,512], index: 0, kind: input, shape index: {}]   ;;  %s2579_s1 = inlined_call_operand.hbm [shape: bf16[512,128], index: 1, kind: input, shape index: {}]   ;;  %s2580_s2 = inlined_call_operand.vmem [shape: f32[1,128], index: 2, kind: input, shape index: {}]   ;;  %s2581_s3 = inlined_call_operand.vmem [shape: f32[1,128], index: 3, kind: input, shape index: {}]   ;;  %s2582_s4 = inlined_call_operand.hbm [shape: f32[512,128], index: 4, kind: output, shape index: {}]  }
   0x1   :  { %11 = vsyncpa [#allocation3 + $0x1], 0 }
   0x2   :  { %12 = vsyncpa [#allocation6], 0 }
   0x3   :  { %13 = vsyncpa [#allocation4], 0 }
   0x4   :  { %15 = vsyncpa [#allocation4 + $0x1], 0  ;;  %s2198_s15 = smov 0   ;;  %s2200_s16 = smov 0  }
   0x5   :  { %s2202_s17 = smov 0   ;;  %s2204_s18 = smov 0  }
   0x6 LB: > { %s2219_s19 = sadd.s32 4294967295, %s2164_s18   ;;  %s1469_s20 = sadd.s32 4294967294, %s2164_s18   ;;  %s2164_s18 = sphi %s2204_s18, %s2592_s18   ;;  %s2160_s17 = sphi %s2202_s17, %s2591_s17   ;;  %s2156_s16 = sphi %s2200_s16, %s2590_s16   ;;  %s2152_s15 = sphi %s2198_s15, %s2589_s15  }
   0x7   : > { %p41_p0 = scmp.ne.s32.totalorder %s2156_s16, %s2152_s15  ;;  %p42_p1 = scmp.eq.s32.totalorder %s2219_s19, 0 }
   0x8   : > { %p128_p2 = scmp.eq.s32.totalorder %s2219_s19, 1  ;;  %p134_p3 = scmp.eq.s32.totalorder %s1469_s20, 1 }
   0x9   : > { %p2228_p4 = por %p42_p1, %p41_p0  ;;  %p1470_p5 = scmp.ge.s32.totalorder %s2164_s18, 1 }
   0xa   : > { %p2233_p6 = por %p134_p3, %p41_p0  ;;  %p141_p7 = scmp.lt.s32.totalorder %s2164_s18, 3 }
   0xb   : > { %s152_s25 = sshll.u32 %s2579_s1, 4  ;;  %s2166_s27 = smov [#allocation5]   ;;  %s153_s25 = int_to_ptr.hbm [resolvable:$true] %s152_s25 }
   0xc   : > { %p2241_p8 = pnand %p1470_p5, %p141_p7  ;;  %s154_s28 = sshll.u32 %s2166_s27, 4  ;;  %s155_s28 = int_to_ptr.vmem [resolvable:$true] %s154_s28 }
   0xd   : > { %s2251_s29 = sadd.s32 1, %s2164_s18   ;;  %s2167_s30 = smov 64  }
   0xe   : > { %p1977_p9 = pneg %p2241_p8  ;;  %s2168_s5 = smov 4  }
   0xf   : > { %s25_s6 = ssub.s32 %s2164_s18, %s2251_s29  ;;  %s28_s7 = sadd.s32 1, %s2160_s17 }
  0x10   : > { %p1978_p10 = pnand %p1977_p9, %p42_p1  ;;  %p26_p12 = scmp.eq.s32.totalorder %s25_s6, 0 }
  0x11   : > { %p35_p13 = scmp.ne.s32.totalorder %s2160_s17, %s2156_s16  ;;  %p36_p0 = scmp.eq.s32.totalorder %s2164_s18, 0 }
  0x12   : > { %1980 = dma.hbm_to_vmem [thread:$0]  (!%p1978_p10), %s153_s25, 4096, %s155_s28, [#allocation6], %s2167_s30, %s2167_s30, %s2168_s5  }
  0x13   : > { %p1990_p3 = scmp.lt.s32.totalorder %s2164_s18, 2  ;;  %p37_p5 = por %p36_p0, %p35_p13 }
  0x14   : > { %s2261_s8 = scalar_select %p26_p12, %s2160_s17, %s28_s7  }
  0x15   : > { %p2265_p7 = por %p128_p2, %p35_p13  ;;  %s174_s10 = sand.u32 1, %s2160_s17  }
  0x16   : > { %s1871_s11 = sshll.u32 %s2164_s18, 9  ;;  %s1473_s12 = sshll.u32 %s174_s10, 9 }
  0x17   : > { %s184_s20 = scalar_lea.hbm %s2578_s0, %s1871_s11  ;;  %s178_s24 = scalar_lea.vmem [#allocation2], %s1473_s12 }
  0x18   : > { %s185_s23 = sshll.u32 %s184_s20, 4  ;;  %s187_s25 = sshll.u32 %s178_s24, 4  ;;  %s186_s23 = int_to_ptr.hbm [resolvable:$true] %s185_s23  ;;  %s188_s25 = int_to_ptr.vmem [resolvable:$true] %s187_s25 }
  0x19   : > { %p2276_p9 = pnand %p1990_p3, %p37_p5  ;;  %s175_s28 = scalar_lea.sflag [#allocation3], %s174_s10 }
  0x1a   : > { %s2064_s30 = sshra.s32 %s186_s23, 4  ;;  %s2071_s11 = scalar_lea.hbm %s2578_s0, 1024  ;;  %s2065_s30 = int_to_ptr.hbm [resolvable:$true] %s2064_s30 }
  0x1b   : > { %s2066_s5 = scalar_lea.hbm %s2065_s30, 512  ;;  %p2068_p10 = pneg %p2276_p9 }
  0x1c   : > { %p2067_p2 = scmp.ne.s32.totalorder %s2065_s30, %s2066_s5  ;;  %p2072_p0 = scmp.lt.s32.totalorder %s2065_s30, %s2578_s0 }
  0x1d   : > { %p2073_p3 = scmp.lt.s32.totalorder %s2071_s11, %s2066_s5 }
  0x1e   : > { %p2069_p12 = pnand %p2068_p10, %p2067_p2 }
  0x1f   : > { %p2074_p5 = por %p2073_p3, %p2072_p0 }
  0x20   : > { %p2070_p13 = pneg %p2069_p12 }
  0x22   : > { %p2075_p11 = pnand %p2074_p5, %p2070_p13 }
  0x24   : > { %2078 = shalt.err (!%p2075_p11)
}
  0x25   : > { %s2169_s10 = smov 256   ;;  %s2170_s14 = smov 16  }
  0x26   : > { %1984 = dma.hbm_to_vmem [thread:$0]  (!%p2276_p9), %s186_s23, 8192, %s188_s25, %s175_s28, %s2169_s10, %s2169_s10, %s2170_s14  }
  0x27   : > { %199 = sbr.rel (%p2241_p8) target bundleno = 475 (0x1db), region = 36  ;;  %s2293_s20 = sand.u32 (!%p2241_p8), 1, %s2156_s16  }
  0x28   : > { %s1478_s24 = sshll.u32 (!%p2241_p8), %s2293_s20, 9  ;;  %s202_s30 = scalar_lea.sflag (!%p2241_p8), [#allocation3], %s2293_s20 }
  0x29   : > { %s2297_s5 = scalar_lea.vmem (!%p2241_p8), [#allocation2], %s1478_s24 }
  0x2c   : > { %2139 = dma.done.wait (%p2228_p4), %s202_s30, 8192  }
  0x2d   : > { %2141 = vsyncadd (%p2228_p4), %s202_s30, 4294959104 }
  0x2e   : > { %2143 = dma.done.wait (%p42_p1), [#allocation6], 4096  }
  0x2f   : > { %2145 = vsyncadd (%p42_p1), [#allocation6], 4294963200  ;;  %v1943_v0 = vld [vmem:[#allocation5 + $0x38] sm:$0xff]  ;;  %v1942_v4 = vld [vmem:[#allocation5 + $0x30] sm:$0xff]  ;;  %s1480_s27 = sshll.u32 %s2293_s20, 8  ;;  %s1968_s6 = sshll.u32 %s2219_s19, 8 }
  0x30   : > { %v1951_v1 = vld [vmem:[#allocation5 + $0x78] sm:$0xff]  ;;  %878 = vmatpush.bf16.msra.mxu0 %v1943_v0  ;;  %v1950_v5 = vld [vmem:[#allocation5 + $0x70] sm:$0xff]  ;;  %v1941_v8 = vld [vmem:[#allocation5 + $0x28] sm:$0xff]  ;;  %s2400_s28 = scalar_lea.vmem [#allocation7], %s1480_s27  ;;  %s1382_s12 = scalar_lea.hbm %s2582_s4, %s1968_s6 }
  0x31   : > { %v1959_v2 = vld [vmem:[#allocation5 + $0xb8] sm:$0xff]  ;;  %967 = vmatpush.bf16.msra.mxu1 %v1951_v1  ;;  %v1958_v6 = vld [vmem:[#allocation5 + $0xb0] sm:$0xff]  ;;  %v1949_v9 = vld [vmem:[#allocation5 + $0x68] sm:$0xff]  ;;  %s1383_s13 = sshll.u32 %s2400_s28, 4  ;;  %s1385_s10 = sshll.u32 %s1382_s12, 4  ;;  %s1384_s13 = int_to_ptr.vmem [resolvable:$true] %s1383_s13  ;;  %s1386_s10 = int_to_ptr.hbm [resolvable:$true] %s1385_s10 }
  0x32   : > { %v1967_v3 = vld [vmem:[#allocation5 + $0xf8] sm:$0xff]  ;;  %1056 = vmatpush.bf16.msra.mxu2 %v1959_v2  ;;  %v1966_v7 = vld [vmem:[#allocation5 + $0xf0] sm:$0xff]  ;;  %v1957_v10 = vld [vmem:[#allocation5 + $0xa8] sm:$0xff]  ;;  %s1371_s19 = scalar_lea.sflag [#allocation4], %s2293_s20  ;;  %s2108_s14 = sshra.s32 %s1386_s10, 4  ;;  %s2109_s14 = int_to_ptr.hbm [resolvable:$true] %s2108_s14 }
  0x33   : > { %1145 = vmatpush.bf16.msra.mxu3 %v1967_v3  ;;  %v1965_v11 = vld [vmem:[#allocation5 + $0xe8] sm:$0xff]  ;;  %v1940_v12 = vld [vmem:[#allocation5 + $0x20] sm:$0xff]  ;;  %v1939_v16 = vld [vmem:[#allocation5 + $0x18] sm:$0xff]  ;;  %s2110_s24 = scalar_lea.hbm %s2109_s14, 256  ;;  %s2114_s21 = scalar_lea.hbm %s2582_s4, 512 }
  0x34   : > { %879 = vmatpush.bf16.msra.mxu0 %v1942_v4  ;;  %v1948_v13 = vld [vmem:[#allocation5 + $0x60] sm:$0xff]  ;;  %v1947_v17 = vld [vmem:[#allocation5 + $0x58] sm:$0xff]  ;;  %v1938_v20 = vld [vmem:[#allocation5 + $0x10] sm:$0xff]  ;;  %p2111_p1 = scmp.ne.s32.totalorder %s2109_s14, %s2110_s24  ;;  %p2115_p11 = scmp.lt.s32.totalorder %s2109_s14, %s2582_s4 }
  0x35   : > { %968 = vmatpush.bf16.msra.mxu1 %v1950_v5  ;;  %v1956_v14 = vld [vmem:[#allocation5 + $0xa0] sm:$0xff]  ;;  %v1955_v18 = vld [vmem:[#allocation5 + $0x98] sm:$0xff]  ;;  %v1946_v21 = vld [vmem:[#allocation5 + $0x50] sm:$0xff]  ;;  %p2116_p9 = scmp.lt.s32.totalorder %s2114_s21, %s2110_s24 }
  0x36   : > { %1057 = vmatpush.bf16.msra.mxu2 %v1958_v6  ;;  %v1964_v15 = vld [vmem:[#allocation5 + $0xe0] sm:$0xff]  ;;  %v1963_v19 = vld [vmem:[#allocation5 + $0xd8] sm:$0xff]  ;;  %v1954_v22 = vld [vmem:[#allocation5 + $0x90] sm:$0xff]  ;;  %p2112_p4 = pnand %p2111_p1, %p2265_p7 }
  0x37   : > { %1146 = vmatpush.bf16.msra.mxu3 %v1966_v7  ;;  %v1962_v23 = vld [vmem:[#allocation5 + $0xd0] sm:$0xff]  ;;  %v1937_v24 = vld [vmem:[#allocation5 + $0x8] sm:$0xff]  ;;  %v1936_v28 = vld [vmem:[#allocation5] sm:$0xff]  ;;  %p2117_p2 = por %p2116_p9, %p2115_p11 }
  0x38   : > { %880 = vmatpush.bf16.msra.mxu0 %v1941_v8  ;;  %v1945_v25 = vld [vmem:[#allocation5 + $0x48] sm:$0xff]  ;;  %v1944_v29 = vld [vmem:[#allocation5 + $0x40] sm:$0xff]  ;;  %v1874_v33 = vld [vmem:[%s2297_s5 + $0xc] sm:$0xf0]  ;;  %p2113_p8 = pneg %p2112_p4 }
  0x39   : > { %969 = vmatpush.bf16.msra.mxu1 %v1949_v9  ;;  %v1953_v26 = vld [vmem:[#allocation5 + $0x88] sm:$0xff]  ;;  %v1952_v30 = vld [vmem:[#allocation5 + $0x80] sm:$0xff]  ;;  %v1485_v35 = vld [vmem:[%s2297_s5 + $0x10] sm:$0xf0] }
  0x3a   : > { %1058 = vmatpush.bf16.msra.mxu2 %v1957_v10  ;;  %v1961_v27 = vld [vmem:[#allocation5 + $0xc8] sm:$0xff]  ;;  %v1960_v31 = vld [vmem:[#allocation5 + $0xc0] sm:$0xff]  ;;  %v1875_v37 = vld [vmem:[%s2297_s5 + $0x14] sm:$0xf0]  ;;  %p2118_p10 = pnand %p2117_p2, %p2113_p8 }
  0x3b   : > { %1147 = vmatpush.bf16.msra.mxu3 %v1965_v11  ;;  %v1483_v32 = vld [vmem:[%s2297_s5] sm:$0xf]  ;;  %v1872_v34 = vld [vmem:[%s2297_s5 + $0x4] sm:$0xf]  ;;  %v1491_v36 = vld [vmem:[%s2297_s5 + $0x8] sm:$0xf] }
  0x3c   : > { %881 = vmatpush.bf16.msra.mxu0 %v1940_v12  ;;  %v1873_v38 = vld [vmem:[%s2297_s5 + $0xc] sm:$0xf]  ;;  %v1493_v39 = vld [vmem:[%s2297_s5 + $0x18] sm:$0xf0]  ;;  %v1484_v40 = vor.u32 %v1874_v33, %v1483_v32  ;;  %v1488_v41 = vor.u32 %v1872_v34, %v1485_v35  ;;  %v1492_v42 = vor.u32 %v1875_v37, %v1491_v36  ;;  %v1499_v44 = vld [vmem:[%s2297_s5 + $0x20] sm:$0xf] }
  0x3d   : > { %970 = vmatpush.bf16.msra.mxu1 %v1948_v13  ;;  %v1496_v43 = vor.u32 %v1873_v38, %v1493_v39  ;;  %v1878_v45 = vld [vmem:[%s2297_s5 + $0x2c] sm:$0xf0]  ;;  %v1876_v46 = vld [vmem:[%s2297_s5 + $0x24] sm:$0xf]  ;;  %v1501_v47 = vld [vmem:[%s2297_s5 + $0x30] sm:$0xf0] }
  0x3e   : > { %1059 = vmatpush.bf16.msra.mxu2 %v1956_v14  ;;  %v1507_v48 = vld [vmem:[%s2297_s5 + $0x28] sm:$0xf]  ;;  %v1879_v49 = vld [vmem:[%s2297_s5 + $0x34] sm:$0xf0]  ;;  %v1877_v50 = vld [vmem:[%s2297_s5 + $0x2c] sm:$0xf]  ;;  %v1500_v52 = vor.u32 %v1878_v45, %v1499_v44  ;;  %v1504_v53 = vor.u32 %v1876_v46, %v1501_v47 }
  0x3f   : > { %1148 = vmatpush.bf16.msra.mxu3 %v1964_v15  ;;  %v1509_v51 = vld [vmem:[%s2297_s5 + $0x38] sm:$0xf0]  ;;  %v1508_v54 = vor.u32 %v1879_v49, %v1507_v48  ;;  %v1515_v56 = vld [vmem:[%s2297_s5 + $0x40] sm:$0xf]  ;;  %v1882_v57 = vld [vmem:[%s2297_s5 + $0x4c] sm:$0xf0] }
  0x40   : > { %882 = vmatpush.bf16.msra.mxu0 %v1939_v16  ;;  %v1512_v55 = vor.u32 %v1877_v50, %v1509_v51  ;;  %v1880_v58 = vld [vmem:[%s2297_s5 + $0x44] sm:$0xf]  ;;  %v1517_v59 = vld [vmem:[%s2297_s5 + $0x50] sm:$0xf0]  ;;  %v1523_v60 = vld [vmem:[%s2297_s5 + $0x48] sm:$0xf]  ;;  %v1516_v0 = vor.u32 %v1882_v57, %v1515_v56 }
  0x41   : > { %971 = vmatpush.bf16.msra.mxu1 %v1947_v17  ;;  %v1883_v61 = vld [vmem:[%s2297_s5 + $0x54] sm:$0xf0]  ;;  %v1881_v62 = vld [vmem:[%s2297_s5 + $0x4c] sm:$0xf]  ;;  %v1525_v63 = vld [vmem:[%s2297_s5 + $0x58] sm:$0xf0]  ;;  %v1520_v1 = vor.u32 %v1880_v58, %v1517_v59 }
  0x42   : > { %1060 = vmatpush.bf16.msra.mxu2 %v1955_v18  ;;  %v1524_v2 = vor.u32 %v1883_v61, %v1523_v60  ;;  %v1528_v3 = vor.u32 %v1881_v62, %v1525_v63  ;;  %v1531_v4 = vld [vmem:[%s2297_s5 + $0x60] sm:$0xf]  ;;  %v1886_v5 = vld [vmem:[%s2297_s5 + $0x6c] sm:$0xf0]  ;;  %v1884_v6 = vld [vmem:[%s2297_s5 + $0x64] sm:$0xf] }
  0x43   : > { %1149 = vmatpush.bf16.msra.mxu3 %v1963_v19  ;;  %v1533_v7 = vld [vmem:[%s2297_s5 + $0x70] sm:$0xf0]  ;;  %v1539_v8 = vld [vmem:[%s2297_s5 + $0x68] sm:$0xf]  ;;  %v1887_v9 = vld [vmem:[%s2297_s5 + $0x74] sm:$0xf0]  ;;  %v1532_v12 = vor.u32 %v1886_v5, %v1531_v4 }
  0x44   : > { %883 = vmatpush.bf16.msra.mxu0 %v1938_v20  ;;  %v1885_v10 = vld [vmem:[%s2297_s5 + $0x6c] sm:$0xf]  ;;  %v1541_v11 = vld [vmem:[%s2297_s5 + $0x78] sm:$0xf0]  ;;  %v1536_v13 = vor.u32 %v1884_v6, %v1533_v7  ;;  %v1540_v14 = vor.u32 %v1887_v9, %v1539_v8  ;;  %v1547_v16 = vld [vmem:[%s2297_s5 + $0x80] sm:$0xf] }
  0x45   : > { %972 = vmatpush.bf16.msra.mxu1 %v1946_v21  ;;  %v1544_v15 = vor.u32 %v1885_v10, %v1541_v11  ;;  %v1890_v17 = vld [vmem:[%s2297_s5 + $0x8c] sm:$0xf0]  ;;  %v1888_v18 = vld [vmem:[%s2297_s5 + $0x84] sm:$0xf]  ;;  %v1549_v19 = vld [vmem:[%s2297_s5 + $0x90] sm:$0xf0] }
  0x46   : > { %1061 = vmatpush.bf16.msra.mxu2 %v1954_v22  ;;  %v1555_v20 = vld [vmem:[%s2297_s5 + $0x88] sm:$0xf]  ;;  %v1891_v21 = vld [vmem:[%s2297_s5 + $0x94] sm:$0xf0]  ;;  %v1889_v22 = vld [vmem:[%s2297_s5 + $0x8c] sm:$0xf] }
  0x47   : > { %1150 = vmatpush.bf16.msra.mxu3 %v1962_v23  ;;  %v1557_v23 = vld [vmem:[%s2297_s5 + $0x98] sm:$0xf0]  ;;  %v1571_v32 = vld [vmem:[%s2297_s5 + $0xa8] sm:$0xf]  ;;  %v1895_v33 = vld [vmem:[%s2297_s5 + $0xb4] sm:$0xf0] }
  0x48   : > { %884 = vmatpush.bf16.msra.mxu0 %v1937_v24  ;;  %v1548_v24 = vor.u32 %v1890_v17, %v1547_v16  ;;  %v1893_v34 = vld [vmem:[%s2297_s5 + $0xac] sm:$0xf]  ;;  %v1573_v35 = vld [vmem:[%s2297_s5 + $0xb8] sm:$0xf0]  ;;  %v1572_v38 = vor.u32 %v1895_v33, %v1571_v32  ;;  %v1587_v44 = vld [vmem:[%s2297_s5 + $0xc8] sm:$0xf] }
  0x49   : > { %973 = vmatpush.bf16.msra.mxu1 %v1945_v25  ;;  %v1552_v25 = vor.u32 %v1888_v18, %v1549_v19  ;;  %v1576_v39 = vor.u32 %v1893_v34, %v1573_v35  ;;  %v1899_v45 = vld [vmem:[%s2297_s5 + $0xd4] sm:$0xf0]  ;;  %v1897_v46 = vld [vmem:[%s2297_s5 + $0xcc] sm:$0xf]  ;;  %v1589_v47 = vld [vmem:[%s2297_s5 + $0xd8] sm:$0xf0] }
  0x4a   : > { %1062 = vmatpush.bf16.msra.mxu2 %v1953_v26  ;;  %v1556_v26 = vor.u32 %v1891_v21, %v1555_v20  ;;  %v1588_v50 = vor.u32 %v1899_v45, %v1587_v44  ;;  %v1592_v51 = vor.u32 %v1897_v46, %v1589_v47  ;;  %v1603_v56 = vld [vmem:[%s2297_s5 + $0xe8] sm:$0xf]  ;;  %v1903_v57 = vld [vmem:[%s2297_s5 + $0xf4] sm:$0xf0]  ;;  %v1901_v58 = vld [vmem:[%s2297_s5 + $0xec] sm:$0xf] }
  0x4b   : > { %1151 = vmatpush.bf16.msra.mxu3 %v1961_v27  ;;  %v1560_v27 = vor.u32 %v1889_v22, %v1557_v23  ;;  %v1605_v59 = vld [vmem:[%s2297_s5 + $0xf8] sm:$0xf0]  ;;  %v1604_v62 = vor.u32 %v1903_v57, %v1603_v56  ;;  %v1619_v4 = vld [vmem:[%s2297_s5 + $0x108] sm:$0xf]  ;;  %v1907_v5 = vld [vmem:[%s2297_s5 + $0x114] sm:$0xf0] }
  0x4c   : > { %885 = vmatpush.bf16.msra.mxu0 %v1936_v28  ;;  %v1563_v28 = vld [vmem:[%s2297_s5 + $0xa0] sm:$0xf]  ;;  %v1608_v63 = vor.u32 %v1901_v58, %v1605_v59  ;;  %v1905_v6 = vld [vmem:[%s2297_s5 + $0x10c] sm:$0xf]  ;;  %v1621_v7 = vld [vmem:[%s2297_s5 + $0x118] sm:$0xf0] }
  0x4d   : > { %974 = vmatpush.bf16.msra.mxu1 %v1944_v29  ;;  %v1894_v29 = vld [vmem:[%s2297_s5 + $0xac] sm:$0xf0]  ;;  %v2382_v18 = vld [vmem:[%s2580_s2] ss:$0 sm:$0xff]  ;;  %v1912_v58 = vld [vmem:[%s2297_s5 + $0x144] sm:$0xf] }
  0x4e   : > { %1063 = vmatpush.bf16.msra.mxu2 %v1952_v30  ;;  %v1892_v30 = vld [vmem:[%s2297_s5 + $0xa4] sm:$0xf]  ;;  %v1564_v36 = vor.u32 %v1894_v29, %v1563_v28  ;;  %v2387_v22 = vld [vmem:[%s2581_s3] ss:$0 sm:$0xff]  ;;  %v1635_v28 = vld [vmem:[%s2297_s5 + $0x128] sm:$0xf] }
  0x4f   : > { %1152 = vmatpush.bf16.msra.mxu3 %v1960_v31  ;;  %886 = vmatmul.bf16.vlgmr.msra.gmra.mxu0 %v1484_v40  ;;  %v1565_v31 = vld [vmem:[%s2297_s5 + $0xb0] sm:$0xf0]  ;;  %v1579_v40 = vld [vmem:[%s2297_s5 + $0xc0] sm:$0xf]  ;;  %v1911_v29 = vld [vmem:[%s2297_s5 + $0x134] sm:$0xf0] }
  0x50   : > { %975 = vmatmul.bf16.vlgmr.msra.gmra.mxu1 %v1488_v41  ;;  %v1568_v37 = vor.u32 %v1892_v30, %v1565_v31  ;;  %v1898_v41 = vld [vmem:[%s2297_s5 + $0xcc] sm:$0xf0]  ;;  %v1627_v23 = vld [vmem:[%s2297_s5 + $0x120] sm:$0xf]  ;;  %v1909_v30 = vld [vmem:[%s2297_s5 + $0x12c] sm:$0xf] }
  0x51   : > { %1064 = vmatmul.bf16.vlgmr.msra.gmra.mxu2 %v1492_v42  ;;  %v1896_v42 = vld [vmem:[%s2297_s5 + $0xc4] sm:$0xf]  ;;  %v1580_v48 = vor.u32 %v1898_v41, %v1579_v40  ;;  %v1637_v31 = vld [vmem:[%s2297_s5 + $0x138] sm:$0xf0]  ;;  %v1914_v56 = vld [vmem:[%s2297_s5 + $0x14c] sm:$0xf0] }
  0x52   : > { %1153 = vmatmul.bf16.vlgmr.msra.gmra.mxu3 %v1496_v43  ;;  %v1581_v43 = vld [vmem:[%s2297_s5 + $0xd0] sm:$0xf0] }
  0x53   : > { %v1584_v49 = vor.u32 %v1896_v42, %v1581_v43  ;;  %v1636_v42 = vor.u32 %v1911_v29, %v1635_v28  ;;  %v1640_v43 = vor.u32 %v1909_v30, %v1637_v31  ;;  %v1645_v59 = vld [vmem:[%s2297_s5 + $0x150] sm:$0xf0]  ;;  %v1916_v28 = vld [vmem:[%s2297_s5 + $0x164] sm:$0xf]  ;;  %v1667_v30 = vld [vmem:[%s2297_s5 + $0x168] sm:$0xf] }
  0x54   : > { %v1661_v29 = vld [vmem:[%s2297_s5 + $0x170] sm:$0xf0]  ;;  %v1919_v31 = vld [vmem:[%s2297_s5 + $0x174] sm:$0xf0] }
  0x5f   : > { %891 = vmatmul.bf16.gmra.mxu0 %v1500_v52  ;;  %v1595_v52 = vld [vmem:[%s2297_s5 + $0xe0] sm:$0xf] }
  0x60   : > { %980 = vmatmul.bf16.gmra.mxu1 %v1504_v53  ;;  %v1902_v53 = vld [vmem:[%s2297_s5 + $0xec] sm:$0xf0] }
  0x61   : > { %1069 = vmatmul.bf16.gmra.mxu2 %v1508_v54  ;;  %v1900_v54 = vld [vmem:[%s2297_s5 + $0xe4] sm:$0xf]  ;;  %v1596_v60 = vor.u32 %v1902_v53, %v1595_v52 }
  0x62   : > { %1158 = vmatmul.bf16.gmra.mxu3 %v1512_v55  ;;  %v1597_v55 = vld [vmem:[%s2297_s5 + $0xf0] sm:$0xf0] }
  0x63   : > { %v1600_v61 = vor.u32 %v1900_v54, %v1597_v55  ;;  %v1643_v55 = vld [vmem:[%s2297_s5 + $0x140] sm:$0xf] }
  0x6f   : > { %896 = vmatmul.bf16.gmra.mxu0 %v1516_v0  ;;  %v1611_v0 = vld [vmem:[%s2297_s5 + $0x100] sm:$0xf] }
  0x70   : > { %985 = vmatmul.bf16.gmra.mxu1 %v1520_v1  ;;  %v1906_v1 = vld [vmem:[%s2297_s5 + $0x10c] sm:$0xf0] }
  0x71   : > { %1074 = vmatmul.bf16.gmra.mxu2 %v1524_v2  ;;  %v1904_v2 = vld [vmem:[%s2297_s5 + $0x104] sm:$0xf]  ;;  %v1612_v8 = vor.u32 %v1906_v1, %v1611_v0 }
  0x72   : > { %1163 = vmatmul.bf16.gmra.mxu3 %v1528_v3  ;;  %v1613_v3 = vld [vmem:[%s2297_s5 + $0x110] sm:$0xf0] }
  0x73   : > { %v1616_v9 = vor.u32 %v1904_v2, %v1613_v3 }
  0x7f   : > { %901 = vmatmul.bf16.gmra.mxu0 %v1532_v12  ;;  %v1620_v12 = vor.u32 %v1907_v5, %v1619_v4  ;;  %v1644_v4 = vor.u32 %v1914_v56, %v1643_v55  ;;  %v1648_v5 = vor.u32 %v1912_v58, %v1645_v59  ;;  %v1922_v58 = vld [vmem:[%s2297_s5 + $0x18c] sm:$0xf0] }
  0x80   : > { %990 = vmatmul.bf16.gmra.mxu1 %v1536_v13  ;;  %v1624_v13 = vor.u32 %v1905_v6, %v1621_v7 }
  0x81   : > { %1079 = vmatmul.bf16.gmra.mxu2 %v1540_v14 }
  0x82   : > { %1168 = vmatmul.bf16.gmra.mxu3 %v1544_v15 }
  0x8f   : > { %906 = vmatmul.bf16.gmra.mxu0 %v1548_v24  ;;  %v1910_v24 = vld [vmem:[%s2297_s5 + $0x12c] sm:$0xf0] }
  0x90   : > { %995 = vmatmul.bf16.gmra.mxu1 %v1552_v25 }
  0x91   : > { %1084 = vmatmul.bf16.gmra.mxu2 %v1556_v26  ;;  %v1908_v26 = vld [vmem:[%s2297_s5 + $0x124] sm:$0xf] }
  0x92   : > { %1173 = vmatmul.bf16.gmra.mxu3 %v1560_v27  ;;  %v1629_v27 = vld [vmem:[%s2297_s5 + $0x130] sm:$0xf0] }
  0x9f   : > { %911 = vmatmul.bf16.gmra.mxu0 %v1564_v36  ;;  %v1628_v36 = vor.u32 %v1910_v24, %v1627_v23 }
  0xa0   : > { %1000 = vmatmul.bf16.gmra.mxu1 %v1568_v37  ;;  %v1632_v37 = vor.u32 %v1908_v26, %v1629_v27  ;;  %v1918_v26 = vld [vmem:[%s2297_s5 + $0x16c] sm:$0xf0] }
  0xa1   : > { %1089 = vmatmul.bf16.gmra.mxu2 %v1572_v38 }
  0xa2   : > { %1178 = vmatmul.bf16.gmra.mxu3 %v1576_v39 }
  0xaf   : > { %916 = vmatmul.bf16.gmra.mxu0 %v1580_v48 }
  0xb0   : > { %1005 = vmatmul.bf16.gmra.mxu1 %v1584_v49 }
  0xb1   : > { %1094 = vmatmul.bf16.gmra.mxu2 %v1588_v50 }
  0xb2   : > { %1183 = vmatmul.bf16.gmra.mxu3 %v1592_v51 }
  0xbf   : > { %921 = vmatmul.bf16.gmra.mxu0 %v1596_v60  ;;  %v1651_v60 = vld [vmem:[%s2297_s5 + $0x148] sm:$0xf] }
  0xc0   : > { %1010 = vmatmul.bf16.gmra.mxu1 %v1600_v61  ;;  %v1915_v61 = vld [vmem:[%s2297_s5 + $0x154] sm:$0xf0] }
  0xc1   : > { %1099 = vmatmul.bf16.gmra.mxu2 %v1604_v62  ;;  %v1913_v62 = vld [vmem:[%s2297_s5 + $0x14c] sm:$0xf] }
  0xc2   : > { %1188 = vmatmul.bf16.gmra.mxu3 %v1608_v63  ;;  %v1653_v63 = vld [vmem:[%s2297_s5 + $0x158] sm:$0xf0] }
  0xcc   : > { %v887_v10 = vpop.f32.mrf.mxu0 }
  0xcd   : > { %v976_v11 = vpop.f32.mrf.mxu1 }
  0xce   : > { %v977_v14 = vadd.f32 %v976_v11, %v887_v10  ;;  %v1652_v10 = vor.u32 %v1915_v61, %v1651_v60  ;;  %v1656_v11 = vor.u32 %v1913_v62, %v1653_v63  ;;  %v1920_v60 = vld [vmem:[%s2297_s5 + $0x184] sm:$0xf]  ;;  %v1677_v61 = vld [vmem:[%s2297_s5 + $0x190] sm:$0xf0]  ;;  %v1683_v62 = vld [vmem:[%s2297_s5 + $0x188] sm:$0xf] }
  0xcf   : > { %926 = vmatmul.bf16.gmra.mxu0 %v1612_v8  ;;  %v1923_v63 = vld [vmem:[%s2297_s5 + $0x194] sm:$0xf0] }
  0xd0   : > { %1015 = vmatmul.bf16.gmra.mxu1 %v1616_v9 }
  0xd1   : > { %1104 = vmatmul.bf16.gmra.mxu2 %v1620_v12 }
  0xd2   : > { %1193 = vmatmul.bf16.gmra.mxu3 %v1624_v13 }
  0xd4   : > { %v1065_v15 = vpop.f32.mrf.mxu2  ;;  %v889_v19 = vpop.f32.mrf.mxu0 }
  0xd5   : > { %v1154_v16 = vpop.f32.mrf.mxu3  ;;  %v1066_v17 = vadd.f32 %v1065_v15, %v977_v14  ;;  %v978_v20 = vpop.f32.mrf.mxu1 }
  0xd6   : > { %v979_v33 = vadd.f32 %v978_v20, %v889_v19 }
  0xd7   : > { %v1155_v21 = vadd.f32 %v1154_v16, %v1066_v17 }
  0xd9   : > { %v1238_v25 = vmul.f32 %v2382_v18, %v1155_v21 }
  0xdb   : > { %v1274_v32 = vadd.f32 %v2387_v22, %v1238_v25  ;;  %v1659_v25 = vld [vmem:[%s2297_s5 + $0x160] sm:$0xf] }
  0xdc   : > { %v1067_v34 = vpop.f32.mrf.mxu2  ;;  %v892_v40 = vpop.f32.mrf.mxu0 }
  0xdd   : > { %v1156_v35 = vpop.f32.mrf.mxu3  ;;  %v1306_v38 = vmax.f32 %v1274_v32, 0.0  ;;  %v1068_v39 = vadd.f32 %v1067_v34, %v979_v33  ;;  %v981_v41 = vpop.f32.mrf.mxu1  ;;  %v1917_v32 = vld [vmem:[%s2297_s5 + $0x16c] sm:$0xf]  ;;  %v1669_v33 = vld [vmem:[%s2297_s5 + $0x178] sm:$0xf0] }
  0xde   : > { %v982_v46 = vadd.f32 %v981_v41, %v892_v40 }
  0xdf   : > { %1338 = vst [vmem:[%s2400_s28] sm:$0xff] %v1306_v38  ;;  %v1157_v44 = vadd.f32 %v1156_v35, %v1068_v39  ;;  %931 = vmatmul.bf16.gmra.mxu0 %v1628_v36  ;;  %v1660_v38 = vor.u32 %v1918_v26, %v1659_v25  ;;  %v1664_v39 = vor.u32 %v1916_v28, %v1661_v29  ;;  %v1926_v28 = vld [vmem:[%s2297_s5 + $0x1ac] sm:$0xf0] }
  0xe0   : > { %1020 = vmatmul.bf16.gmra.mxu1 %v1632_v37 }
  0xe1   : > { %v1239_v45 = vmul.f32 %v2382_v18, %v1157_v44  ;;  %1109 = vmatmul.bf16.gmra.mxu2 %v1636_v42  ;;  %v1668_v44 = vor.u32 %v1919_v31, %v1667_v30  ;;  %v1924_v30 = vld [vmem:[%s2297_s5 + $0x1a4] sm:$0xf]  ;;  %v1693_v31 = vld [vmem:[%s2297_s5 + $0x1b0] sm:$0xf0] }
  0xe2   : > { %1198 = vmatmul.bf16.gmra.mxu3 %v1640_v43 }
  0xe3   : > { %v1275_v47 = vadd.f32 %v2387_v22, %v1239_v45  ;;  %v1672_v45 = vor.u32 %v1917_v32, %v1669_v33  ;;  %v1699_v32 = vld [vmem:[%s2297_s5 + $0x1a8] sm:$0xf]  ;;  %v1927_v33 = vld [vmem:[%s2297_s5 + $0x1b4] sm:$0xf0] }
  0xe4   : > { %v1070_v48 = vpop.f32.mrf.mxu2  ;;  %v894_v52 = vpop.f32.mrf.mxu0 }
  0xe5   : > { %v1159_v49 = vpop.f32.mrf.mxu3  ;;  %v1307_v50 = vmax.f32 %v1275_v47, 0.0  ;;  %v1071_v51 = vadd.f32 %v1070_v48, %v982_v46  ;;  %v983_v53 = vpop.f32.mrf.mxu1 }
  0xe6   : > { %v984_v1 = vadd.f32 %v983_v53, %v894_v52 }
  0xe7   : > { %1339 = vst [vmem:[%s2400_s28 + $0x8] sm:$0xff] %v1307_v50  ;;  %v1160_v54 = vadd.f32 %v1159_v49, %v1071_v51 }
  0xe9   : > { %v1240_v57 = vmul.f32 %v2382_v18, %v1160_v54 }
  0xeb   : > { %v1276_v0 = vadd.f32 %v2387_v22, %v1240_v57  ;;  %v1675_v57 = vld [vmem:[%s2297_s5 + $0x180] sm:$0xf] }
  0xec   : > { %v1072_v2 = vpop.f32.mrf.mxu2  ;;  %v897_v8 = vpop.f32.mrf.mxu0 }
  0xed   : > { %v1161_v3 = vpop.f32.mrf.mxu3  ;;  %v1308_v6 = vmax.f32 %v1276_v0, 0.0  ;;  %v1073_v7 = vadd.f32 %v1072_v2, %v984_v1  ;;  %v986_v9 = vpop.f32.mrf.mxu1  ;;  %v1921_v0 = vld [vmem:[%s2297_s5 + $0x18c] sm:$0xf]  ;;  %v1685_v1 = vld [vmem:[%s2297_s5 + $0x198] sm:$0xf0] }
  0xee   : > { %v987_v14 = vadd.f32 %v986_v9, %v897_v8 }
  0xef   : > { %1340 = vst [vmem:[%s2400_s28 + $0x10] sm:$0xff] %v1308_v6  ;;  %v1162_v12 = vadd.f32 %v1161_v3, %v1073_v7  ;;  %936 = vmatmul.bf16.gmra.mxu0 %v1644_v4  ;;  %v1676_v6 = vor.u32 %v1922_v58, %v1675_v57  ;;  %v1680_v7 = vor.u32 %v1920_v60, %v1677_v61  ;;  %v1930_v60 = vld [vmem:[%s2297_s5 + $0x1cc] sm:$0xf0] }
  0xf0   : > { %1025 = vmatmul.bf16.gmra.mxu1 %v1648_v5 }
  0xf1   : > { %v1241_v13 = vmul.f32 %v2382_v18, %v1162_v12  ;;  %1114 = vmatmul.bf16.gmra.mxu2 %v1652_v10  ;;  %v1684_v12 = vor.u32 %v1923_v63, %v1683_v62  ;;  %v1928_v62 = vld [vmem:[%s2297_s5 + $0x1c4] sm:$0xf]  ;;  %v1709_v63 = vld [vmem:[%s2297_s5 + $0x1d0] sm:$0xf0] }
  0xf2   : > { %1203 = vmatmul.bf16.gmra.mxu3 %v1656_v11 }
  0xf3   : > { %v1277_v15 = vadd.f32 %v2387_v22, %v1241_v13  ;;  %v1688_v13 = vor.u32 %v1921_v0, %v1685_v1  ;;  %v1715_v0 = vld [vmem:[%s2297_s5 + $0x1c8] sm:$0xf]  ;;  %v1931_v1 = vld [vmem:[%s2297_s5 + $0x1d4] sm:$0xf0] }
  0xf4   : > { %v1075_v16 = vpop.f32.mrf.mxu2  ;;  %v899_v21 = vpop.f32.mrf.mxu0 }
  0xf5   : > { %v1164_v17 = vpop.f32.mrf.mxu3  ;;  %v1309_v19 = vmax.f32 %v1277_v15, 0.0  ;;  %v1076_v20 = vadd.f32 %v1075_v16, %v987_v14  ;;  %v988_v23 = vpop.f32.mrf.mxu1 }
  0xf6   : > { %v989_v35 = vadd.f32 %v988_v23, %v899_v21 }
  0xf7   : > { %1341 = vst [vmem:[%s2400_s28 + $0x18] sm:$0xff] %v1309_v19  ;;  %v1165_v24 = vadd.f32 %v1164_v17, %v1076_v20 }
  0xf9   : > { %v1242_v27 = vmul.f32 %v2382_v18, %v1165_v24 }
  0xfb   : > { %v1278_v34 = vadd.f32 %v2387_v22, %v1242_v27  ;;  %v1691_v27 = vld [vmem:[%s2297_s5 + $0x1a0] sm:$0xf] }
  0xfc   : > { %v1077_v36 = vpop.f32.mrf.mxu2  ;;  %v902_v42 = vpop.f32.mrf.mxu0 }
  0xfd   : > { %v1166_v37 = vpop.f32.mrf.mxu3  ;;  %v1310_v40 = vmax.f32 %v1278_v34, 0.0  ;;  %v1078_v41 = vadd.f32 %v1077_v36, %v989_v35  ;;  %v991_v43 = vpop.f32.mrf.mxu1  ;;  %v1925_v34 = vld [vmem:[%s2297_s5 + $0x1ac] sm:$0xf]  ;;  %v1701_v35 = vld [vmem:[%s2297_s5 + $0x1b8] sm:$0xf0] }
  0xfe   : > { %v992_v48 = vadd.f32 %v991_v43, %v902_v42 }
  0xff   : > { %1342 = vst [vmem:[%s2400_s28 + $0x20] sm:$0xff] %v1310_v40  ;;  %v1167_v46 = vadd.f32 %v1166_v37, %v1078_v41  ;;  %941 = vmatmul.bf16.gmra.mxu0 %v1660_v38  ;;  %v1692_v40 = vor.u32 %v1926_v28, %v1691_v27  ;;  %v1696_v41 = vor.u32 %v1924_v30, %v1693_v31  ;;  %v1934_v30 = vld [vmem:[%s2297_s5 + $0x1ec] sm:$0xf0] }
 0x100   : > { %1030 = vmatmul.bf16.gmra.mxu1 %v1664_v39 }
 0x101   : > { %v1243_v47 = vmul.f32 %v2382_v18, %v1167_v46  ;;  %1119 = vmatmul.bf16.gmra.mxu2 %v1668_v44  ;;  %v1700_v46 = vor.u32 %v1927_v33, %v1699_v32  ;;  %v1932_v32 = vld [vmem:[%s2297_s5 + $0x1e4] sm:$0xf]  ;;  %v1725_v33 = vld [vmem:[%s2297_s5 + $0x1f0] sm:$0xf0] }
 0x102   : > { %1208 = vmatmul.bf16.gmra.mxu3 %v1672_v45 }
 0x103   : > { %v1279_v49 = vadd.f32 %v2387_v22, %v1243_v47  ;;  %v1704_v47 = vor.u32 %v1925_v34, %v1701_v35  ;;  %v1731_v34 = vld [vmem:[%s2297_s5 + $0x1e8] sm:$0xf]  ;;  %v1935_v35 = vld [vmem:[%s2297_s5 + $0x1f4] sm:$0xf0] }
 0x104   : > { %v1080_v50 = vpop.f32.mrf.mxu2  ;;  %v904_v54 = vpop.f32.mrf.mxu0 }
 0x105   : > { %v1169_v51 = vpop.f32.mrf.mxu3  ;;  %v1311_v52 = vmax.f32 %v1279_v49, 0.0  ;;  %v1081_v53 = vadd.f32 %v1080_v50, %v992_v48  ;;  %v993_v55 = vpop.f32.mrf.mxu1 }
 0x106   : > { %v994_v3 = vadd.f32 %v993_v55, %v904_v54 }
 0x107   : > { %1343 = vst [vmem:[%s2400_s28 + $0x28] sm:$0xff] %v1311_v52  ;;  %v1170_v56 = vadd.f32 %v1169_v51, %v1081_v53 }
 0x109   : > { %v1244_v59 = vmul.f32 %v2382_v18, %v1170_v56 }
 0x10b   : > { %v1280_v2 = vadd.f32 %v2387_v22, %v1244_v59  ;;  %v1707_v59 = vld [vmem:[%s2297_s5 + $0x1c0] sm:$0xf] }
 0x10c   : > { %v1082_v4 = vpop.f32.mrf.mxu2  ;;  %v907_v10 = vpop.f32.mrf.mxu0 }
 0x10d   : > { %v1171_v5 = vpop.f32.mrf.mxu3  ;;  %v1312_v8 = vmax.f32 %v1280_v2, 0.0  ;;  %v1083_v9 = vadd.f32 %v1082_v4, %v994_v3  ;;  %v996_v11 = vpop.f32.mrf.mxu1  ;;  %v1929_v2 = vld [vmem:[%s2297_s5 + $0x1cc] sm:$0xf]  ;;  %v1717_v3 = vld [vmem:[%s2297_s5 + $0x1d8] sm:$0xf0] }
 0x10e   : > { %v997_v16 = vadd.f32 %v996_v11, %v907_v10 }
 0x10f   : > { %1344 = vst [vmem:[%s2400_s28 + $0x30] sm:$0xff] %v1312_v8  ;;  %v1172_v14 = vadd.f32 %v1171_v5, %v1083_v9  ;;  %946 = vmatmul.bf16.gmra.mxu0 %v1676_v6  ;;  %v1708_v8 = vor.u32 %v1930_v60, %v1707_v59  ;;  %v1712_v9 = vor.u32 %v1928_v62, %v1709_v63 }
 0x110   : > { %1035 = vmatmul.bf16.gmra.mxu1 %v1680_v7 }
 0x111   : > { %v1245_v15 = vmul.f32 %v2382_v18, %v1172_v14  ;;  %1124 = vmatmul.bf16.gmra.mxu2 %v1684_v12  ;;  %v1716_v14 = vor.u32 %v1931_v1, %v1715_v0 }
 0x112   : > { %1213 = vmatmul.bf16.gmra.mxu3 %v1688_v13 }
 0x113   : > { %v1281_v17 = vadd.f32 %v2387_v22, %v1245_v15  ;;  %v1720_v15 = vor.u32 %v1929_v2, %v1717_v3 }
 0x114   : > { %v1085_v19 = vpop.f32.mrf.mxu2  ;;  %v909_v24 = vpop.f32.mrf.mxu0 }
 0x115   : > { %v1174_v20 = vpop.f32.mrf.mxu3  ;;  %v1313_v21 = vmax.f32 %v1281_v17, 0.0  ;;  %v1086_v23 = vadd.f32 %v1085_v19, %v997_v16  ;;  %v998_v25 = vpop.f32.mrf.mxu1 }
 0x116   : > { %v999_v37 = vadd.f32 %v998_v25, %v909_v24 }
 0x117   : > { %1345 = vst [vmem:[%s2400_s28 + $0x38] sm:$0xff] %v1313_v21  ;;  %v1175_v26 = vadd.f32 %v1174_v20, %v1086_v23 }
 0x119   : > { %v1246_v29 = vmul.f32 %v2382_v18, %v1175_v26 }
 0x11b   : > { %v1282_v36 = vadd.f32 %v2387_v22, %v1246_v29  ;;  %v1723_v29 = vld [vmem:[%s2297_s5 + $0x1e0] sm:$0xf] }
 0x11c   : > { %v1087_v38 = vpop.f32.mrf.mxu2  ;;  %v912_v44 = vpop.f32.mrf.mxu0 }
 0x11d   : > { %v1176_v39 = vpop.f32.mrf.mxu3  ;;  %v1314_v42 = vmax.f32 %v1282_v36, 0.0  ;;  %v1088_v43 = vadd.f32 %v1087_v38, %v999_v37  ;;  %v1001_v45 = vpop.f32.mrf.mxu1  ;;  %v1933_v36 = vld [vmem:[%s2297_s5 + $0x1ec] sm:$0xf]  ;;  %v1733_v37 = vld [vmem:[%s2297_s5 + $0x1f8] sm:$0xf0] }
 0x11e   : > { %v1002_v50 = vadd.f32 %v1001_v45, %v912_v44 }
 0x11f   : > { %1346 = vst [vmem:[%s2400_s28 + $0x40] sm:$0xff] %v1314_v42  ;;  %v1177_v48 = vadd.f32 %v1176_v39, %v1088_v43  ;;  %951 = vmatmul.bf16.gmra.mxu0 %v1692_v40  ;;  %v1724_v42 = vor.u32 %v1934_v30, %v1723_v29  ;;  %v1728_v43 = vor.u32 %v1932_v32, %v1725_v33 }
 0x120   : > { %1040 = vmatmul.bf16.gmra.mxu1 %v1696_v41 }
 0x121   : > { %v1247_v49 = vmul.f32 %v2382_v18, %v1177_v48  ;;  %1129 = vmatmul.bf16.gmra.mxu2 %v1700_v46  ;;  %v1732_v48 = vor.u32 %v1935_v35, %v1731_v34 }
 0x122   : > { %1218 = vmatmul.bf16.gmra.mxu3 %v1704_v47 }
 0x123   : > { %v1283_v51 = vadd.f32 %v2387_v22, %v1247_v49  ;;  %v1736_v49 = vor.u32 %v1933_v36, %v1733_v37 }
 0x124   : > { %v1090_v52 = vpop.f32.mrf.mxu2  ;;  %v914_v56 = vpop.f32.mrf.mxu0 }
 0x125   : > { %v1179_v53 = vpop.f32.mrf.mxu3  ;;  %v1315_v54 = vmax.f32 %v1283_v51, 0.0  ;;  %v1091_v55 = vadd.f32 %v1090_v52, %v1002_v50  ;;  %v1003_v57 = vpop.f32.mrf.mxu1 }
 0x126   : > { %v1004_v5 = vadd.f32 %v1003_v57, %v914_v56 }
 0x127   : > { %1347 = vst [vmem:[%s2400_s28 + $0x48] sm:$0xff] %v1315_v54  ;;  %v1180_v58 = vadd.f32 %v1179_v53, %v1091_v55 }
 0x129   : > { %v1248_v61 = vmul.f32 %v2382_v18, %v1180_v58 }
 0x12b   : > { %v1284_v4 = vadd.f32 %v2387_v22, %v1248_v61 }
 0x12c   : > { %v1092_v6 = vpop.f32.mrf.mxu2  ;;  %v917_v12 = vpop.f32.mrf.mxu0 }
 0x12d   : > { %v1181_v7 = vpop.f32.mrf.mxu3  ;;  %v1316_v10 = vmax.f32 %v1284_v4, 0.0  ;;  %v1093_v11 = vadd.f32 %v1092_v6, %v1004_v5  ;;  %v1006_v13 = vpop.f32.mrf.mxu1 }
 0x12e   : > { %v1007_v19 = vadd.f32 %v1006_v13, %v917_v12 }
 0x12f   : > { %1348 = vst [vmem:[%s2400_s28 + $0x50] sm:$0xff] %v1316_v10  ;;  %v1182_v16 = vadd.f32 %v1181_v7, %v1093_v11  ;;  %956 = vmatmul.bf16.gmra.mxu0 %v1708_v8 }
 0x130   : > { %1045 = vmatmul.bf16.gmra.mxu1 %v1712_v9 }
 0x131   : > { %v1249_v17 = vmul.f32 %v2382_v18, %v1182_v16  ;;  %1134 = vmatmul.bf16.gmra.mxu2 %v1716_v14 }
 0x132   : > { %1223 = vmatmul.bf16.gmra.mxu3 %v1720_v15 }
 0x133   : > { %v1285_v20 = vadd.f32 %v2387_v22, %v1249_v17 }
 0x134   : > { %v1095_v21 = vpop.f32.mrf.mxu2  ;;  %v919_v26 = vpop.f32.mrf.mxu0 }
 0x135   : > { %v1184_v23 = vpop.f32.mrf.mxu3  ;;  %v1317_v24 = vmax.f32 %v1285_v20, 0.0  ;;  %v1096_v25 = vadd.f32 %v1095_v21, %v1007_v19  ;;  %v1008_v27 = vpop.f32.mrf.mxu1 }
 0x136   : > { %v1009_v39 = vadd.f32 %v1008_v27, %v919_v26 }
 0x137   : > { %1349 = vst [vmem:[%s2400_s28 + $0x58] sm:$0xff] %v1317_v24  ;;  %v1185_v28 = vadd.f32 %v1184_v23, %v1096_v25 }
 0x139   : > { %v1250_v31 = vmul.f32 %v2382_v18, %v1185_v28 }
 0x13b   : > { %v1286_v38 = vadd.f32 %v2387_v22, %v1250_v31 }
 0x13c   : > { %v1097_v40 = vpop.f32.mrf.mxu2  ;;  %v922_v46 = vpop.f32.mrf.mxu0 }
 0x13d   : > { %v1186_v41 = vpop.f32.mrf.mxu3  ;;  %v1318_v44 = vmax.f32 %v1286_v38, 0.0  ;;  %v1098_v45 = vadd.f32 %v1097_v40, %v1009_v39  ;;  %v1011_v47 = vpop.f32.mrf.mxu1 }
 0x13e   : > { %v1012_v52 = vadd.f32 %v1011_v47, %v922_v46 }
 0x13f   : > { %1350 = vst [vmem:[%s2400_s28 + $0x60] sm:$0xff] %v1318_v44  ;;  %v1187_v50 = vadd.f32 %v1186_v41, %v1098_v45  ;;  %961 = vmatmul.bf16.gmra.mxu0 %v1724_v42 }
 0x140   : > { %1050 = vmatmul.bf16.gmra.mxu1 %v1728_v43 }
 0x141   : > { %v1251_v51 = vmul.f32 %v2382_v18, %v1187_v50  ;;  %1139 = vmatmul.bf16.gmra.mxu2 %v1732_v48 }
 0x142   : > { %1228 = vmatmul.bf16.gmra.mxu3 %v1736_v49 }
 0x143   : > { %v1287_v53 = vadd.f32 %v2387_v22, %v1251_v51 }
 0x144   : > { %v1100_v54 = vpop.f32.mrf.mxu2  ;;  %v924_v58 = vpop.f32.mrf.mxu0 }
 0x145   : > { %v1189_v55 = vpop.f32.mrf.mxu3  ;;  %v1319_v56 = vmax.f32 %v1287_v53, 0.0  ;;  %v1101_v57 = vadd.f32 %v1100_v54, %v1012_v52  ;;  %v1013_v59 = vpop.f32.mrf.mxu1 }
 0x146   : > { %v1014_v63 = vadd.f32 %v1013_v59, %v924_v58 }
 0x147   : > { %1351 = vst [vmem:[%s2400_s28 + $0x68] sm:$0xff] %v1319_v56  ;;  %v1190_v60 = vadd.f32 %v1189_v55, %v1101_v57 }
 0x149   : > { %v1252_v61 = vmul.f32 %v2382_v18, %v1190_v60 }
 0x14b   : > { %v1288_v62 = vadd.f32 %v2387_v22, %v1252_v61 }
 0x14c   : > { %v1102_v0 = vpop.f32.mrf.mxu2  ;;  %v927_v4 = vpop.f32.mrf.mxu0 }
 0x14d   : > { %v1191_v1 = vpop.f32.mrf.mxu3  ;;  %v1320_v2 = vmax.f32 %v1288_v62, 0.0  ;;  %v1103_v3 = vadd.f32 %v1102_v0, %v1014_v63  ;;  %v1016_v5 = vpop.f32.mrf.mxu1 }
 0x14e   : > { %v1017_v8 = vadd.f32 %v1016_v5, %v927_v4 }
 0x14f   : > { %1352 = vst [vmem:[%s2400_s28 + $0x70] sm:$0xff] %v1320_v2  ;;  %v1192_v6 = vadd.f32 %v1191_v1, %v1103_v3 }
 0x151   : > { %v1253_v7 = vmul.f32 %v2382_v18, %v1192_v6 }
 0x153   : > { %v1289_v9 = vadd.f32 %v2387_v22, %v1253_v7 }
 0x154   : > { %v1105_v10 = vpop.f32.mrf.mxu2  ;;  %v929_v14 = vpop.f32.mrf.mxu0 }
 0x155   : > { %v1194_v11 = vpop.f32.mrf.mxu3  ;;  %v1321_v12 = vmax.f32 %v1289_v9, 0.0  ;;  %v1106_v13 = vadd.f32 %v1105_v10, %v1017_v8  ;;  %v1018_v15 = vpop.f32.mrf.mxu1 }
 0x156   : > { %v1019_v20 = vadd.f32 %v1018_v15, %v929_v14 }
 0x157   : > { %1353 = vst [vmem:[%s2400_s28 + $0x78] sm:$0xff] %v1321_v12  ;;  %v1195_v16 = vadd.f32 %v1194_v11, %v1106_v13 }
 0x159   : > { %v1254_v17 = vmul.f32 %v2382_v18, %v1195_v16 }
 0x15b   : > { %v1290_v19 = vadd.f32 %v2387_v22, %v1254_v17 }
 0x15c   : > { %v1107_v21 = vpop.f32.mrf.mxu2  ;;  %v932_v26 = vpop.f32.mrf.mxu0 }
 0x15d   : > { %v1196_v23 = vpop.f32.mrf.mxu3  ;;  %v1322_v24 = vmax.f32 %v1290_v19, 0.0  ;;  %v1108_v25 = vadd.f32 %v1107_v21, %v1019_v20  ;;  %v1021_v27 = vpop.f32.mrf.mxu1 }
 0x15e   : > { %v1022_v30 = vadd.f32 %v1021_v27, %v932_v26 }
 0x15f   : > { %1354 = vst [vmem:[%s2400_s28 + $0x80] sm:$0xff] %v1322_v24  ;;  %v1197_v28 = vadd.f32 %v1196_v23, %v1108_v25 }
 0x161   : > { %v1255_v29 = vmul.f32 %v2382_v18, %v1197_v28 }
 0x163   : > { %v1291_v31 = vadd.f32 %v2387_v22, %v1255_v29 }
 0x164   : > { %v1110_v32 = vpop.f32.mrf.mxu2  ;;  %v934_v36 = vpop.f32.mrf.mxu0 }
 0x165   : > { %v1199_v33 = vpop.f32.mrf.mxu3  ;;  %v1323_v34 = vmax.f32 %v1291_v31, 0.0  ;;  %v1111_v35 = vadd.f32 %v1110_v32, %v1022_v30  ;;  %v1023_v37 = vpop.f32.mrf.mxu1 }
 0x166   : > { %v1024_v41 = vadd.f32 %v1023_v37, %v934_v36 }
 0x167   : > { %1355 = vst [vmem:[%s2400_s28 + $0x88] sm:$0xff] %v1323_v34  ;;  %v1200_v38 = vadd.f32 %v1199_v33, %v1111_v35 }
 0x169   : > { %v1256_v39 = vmul.f32 %v2382_v18, %v1200_v38 }
 0x16b   : > { %v1292_v40 = vadd.f32 %v2387_v22, %v1256_v39 }
 0x16c   : > { %v1112_v42 = vpop.f32.mrf.mxu2  ;;  %v937_v46 = vpop.f32.mrf.mxu0 }
 0x16d   : > { %v1201_v43 = vpop.f32.mrf.mxu3  ;;  %v1324_v44 = vmax.f32 %v1292_v40, 0.0  ;;  %v1113_v45 = vadd.f32 %v1112_v42, %v1024_v41  ;;  %v1026_v47 = vpop.f32.mrf.mxu1 }
 0x16e   : > { %v1027_v50 = vadd.f32 %v1026_v47, %v937_v46 }
 0x16f   : > { %1356 = vst [vmem:[%s2400_s28 + $0x90] sm:$0xff] %v1324_v44  ;;  %v1202_v48 = vadd.f32 %v1201_v43, %v1113_v45 }
 0x171   : > { %v1257_v49 = vmul.f32 %v2382_v18, %v1202_v48 }
 0x173   : > { %v1293_v51 = vadd.f32 %v2387_v22, %v1257_v49 }
 0x174   : > { %v1115_v52 = vpop.f32.mrf.mxu2  ;;  %v939_v56 = vpop.f32.mrf.mxu0 }
 0x175   : > { %v1204_v53 = vpop.f32.mrf.mxu3  ;;  %v1325_v54 = vmax.f32 %v1293_v51, 0.0  ;;  %v1116_v55 = vadd.f32 %v1115_v52, %v1027_v50  ;;  %v1028_v57 = vpop.f32.mrf.mxu1 }
 0x176   : > { %v1029_v61 = vadd.f32 %v1028_v57, %v939_v56 }
 0x177   : > { %1357 = vst [vmem:[%s2400_s28 + $0x98] sm:$0xff] %v1325_v54  ;;  %v1205_v58 = vadd.f32 %v1204_v53, %v1116_v55 }
 0x179   : > { %v1258_v59 = vmul.f32 %v2382_v18, %v1205_v58 }
 0x17b   : > { %v1294_v60 = vadd.f32 %v2387_v22, %v1258_v59 }
 0x17c   : > { %v1117_v62 = vpop.f32.mrf.mxu2  ;;  %v942_v2 = vpop.f32.mrf.mxu0 }
 0x17d   : > { %v1206_v63 = vpop.f32.mrf.mxu3  ;;  %v1326_v0 = vmax.f32 %v1294_v60, 0.0  ;;  %v1118_v1 = vadd.f32 %v1117_v62, %v1029_v61  ;;  %v1031_v3 = vpop.f32.mrf.mxu1 }
 0x17e   : > { %v1032_v6 = vadd.f32 %v1031_v3, %v942_v2 }
 0x17f   : > { %1358 = vst [vmem:[%s2400_s28 + $0xa0] sm:$0xff] %v1326_v0  ;;  %v1207_v4 = vadd.f32 %v1206_v63, %v1118_v1 }
 0x181   : > { %v1259_v5 = vmul.f32 %v2382_v18, %v1207_v4 }
 0x183   : > { %v1295_v7 = vadd.f32 %v2387_v22, %v1259_v5 }
 0x184   : > { %v1120_v8 = vpop.f32.mrf.mxu2  ;;  %v944_v12 = vpop.f32.mrf.mxu0 }
 0x185   : > { %v1209_v9 = vpop.f32.mrf.mxu3  ;;  %v1327_v10 = vmax.f32 %v1295_v7, 0.0  ;;  %v1121_v11 = vadd.f32 %v1120_v8, %v1032_v6  ;;  %v1033_v13 = vpop.f32.mrf.mxu1 }
 0x186   : > { %v1034_v17 = vadd.f32 %v1033_v13, %v944_v12 }
 0x187   : > { %1359 = vst [vmem:[%s2400_s28 + $0xa8] sm:$0xff] %v1327_v10  ;;  %v1210_v14 = vadd.f32 %v1209_v9, %v1121_v11 }
 0x189   : > { %v1260_v15 = vmul.f32 %v2382_v18, %v1210_v14 }
 0x18b   : > { %v1296_v16 = vadd.f32 %v2387_v22, %v1260_v15 }
 0x18c   : > { %v1122_v19 = vpop.f32.mrf.mxu2  ;;  %v947_v24 = vpop.f32.mrf.mxu0 }
 0x18d   : > { %v1211_v20 = vpop.f32.mrf.mxu3  ;;  %v1328_v21 = vmax.f32 %v1296_v16, 0.0  ;;  %v1123_v23 = vadd.f32 %v1122_v19, %v1034_v17  ;;  %v1036_v25 = vpop.f32.mrf.mxu1 }
 0x18e   : > { %v1037_v28 = vadd.f32 %v1036_v25, %v947_v24 }
 0x18f   : > { %1360 = vst [vmem:[%s2400_s28 + $0xb0] sm:$0xff] %v1328_v21  ;;  %v1212_v26 = vadd.f32 %v1211_v20, %v1123_v23 }
 0x191   : > { %v1261_v27 = vmul.f32 %v2382_v18, %v1212_v26 }
 0x193   : > { %v1297_v29 = vadd.f32 %v2387_v22, %v1261_v27 }
 0x194   : > { %v1125_v30 = vpop.f32.mrf.mxu2  ;;  %v949_v34 = vpop.f32.mrf.mxu0 }
 0x195   : > { %v1214_v31 = vpop.f32.mrf.mxu3  ;;  %v1329_v32 = vmax.f32 %v1297_v29, 0.0  ;;  %v1126_v33 = vadd.f32 %v1125_v30, %v1037_v28  ;;  %v1038_v35 = vpop.f32.mrf.mxu1 }
 0x196   : > { %v1039_v39 = vadd.f32 %v1038_v35, %v949_v34 }
 0x197   : > { %1361 = vst [vmem:[%s2400_s28 + $0xb8] sm:$0xff] %v1329_v32  ;;  %v1215_v36 = vadd.f32 %v1214_v31, %v1126_v33 }
 0x199   : > { %v1262_v37 = vmul.f32 %v2382_v18, %v1215_v36 }
 0x19b   : > { %v1298_v38 = vadd.f32 %v2387_v22, %v1262_v37 }
 0x19c   : > { %v1127_v40 = vpop.f32.mrf.mxu2  ;;  %v952_v44 = vpop.f32.mrf.mxu0 }
 0x19d   : > { %v1216_v41 = vpop.f32.mrf.mxu3  ;;  %v1330_v42 = vmax.f32 %v1298_v38, 0.0  ;;  %v1128_v43 = vadd.f32 %v1127_v40, %v1039_v39  ;;  %v1041_v45 = vpop.f32.mrf.mxu1 }
 0x19e   : > { %v1042_v48 = vadd.f32 %v1041_v45, %v952_v44 }
 0x19f   : > { %1362 = vst [vmem:[%s2400_s28 + $0xc0] sm:$0xff] %v1330_v42  ;;  %v1217_v46 = vadd.f32 %v1216_v41, %v1128_v43 }
 0x1a1   : > { %v1263_v47 = vmul.f32 %v2382_v18, %v1217_v46 }
 0x1a3   : > { %v1299_v49 = vadd.f32 %v2387_v22, %v1263_v47 }
 0x1a4   : > { %v1130_v50 = vpop.f32.mrf.mxu2  ;;  %v954_v54 = vpop.f32.mrf.mxu0 }
 0x1a5   : > { %v1219_v51 = vpop.f32.mrf.mxu3  ;;  %v1331_v52 = vmax.f32 %v1299_v49, 0.0  ;;  %v1131_v53 = vadd.f32 %v1130_v50, %v1042_v48  ;;  %v1043_v55 = vpop.f32.mrf.mxu1 }
 0x1a6   : > { %v1044_v59 = vadd.f32 %v1043_v55, %v954_v54 }
 0x1a7   : > { %1363 = vst [vmem:[%s2400_s28 + $0xc8] sm:$0xff] %v1331_v52  ;;  %v1220_v56 = vadd.f32 %v1219_v51, %v1131_v53 }
 0x1a9   : > { %v1264_v57 = vmul.f32 %v2382_v18, %v1220_v56 }
 0x1ab   : > { %v1300_v58 = vadd.f32 %v2387_v22, %v1264_v57 }
 0x1ac   : > { %v1132_v60 = vpop.f32.mrf.mxu2  ;;  %v957_v0 = vpop.f32.mrf.mxu0 }
 0x1ad   : > { %v1221_v61 = vpop.f32.mrf.mxu3  ;;  %v1332_v62 = vmax.f32 %v1300_v58, 0.0  ;;  %v1133_v63 = vadd.f32 %v1132_v60, %v1044_v59  ;;  %v1046_v1 = vpop.f32.mrf.mxu1 }
 0x1ae   : > { %v1047_v4 = vadd.f32 %v1046_v1, %v957_v0 }
 0x1af   : > { %1364 = vst [vmem:[%s2400_s28 + $0xd0] sm:$0xff] %v1332_v62  ;;  %v1222_v2 = vadd.f32 %v1221_v61, %v1133_v63 }
 0x1b1   : > { %v1265_v3 = vmul.f32 %v2382_v18, %v1222_v2 }
 0x1b3   : > { %v1301_v5 = vadd.f32 %v2387_v22, %v1265_v3 }
 0x1b4   : > { %v1135_v6 = vpop.f32.mrf.mxu2  ;;  %v959_v10 = vpop.f32.mrf.mxu0 }
 0x1b5   : > { %v1224_v7 = vpop.f32.mrf.mxu3  ;;  %v1333_v8 = vmax.f32 %v1301_v5, 0.0  ;;  %v1136_v9 = vadd.f32 %v1135_v6, %v1047_v4  ;;  %v1048_v11 = vpop.f32.mrf.mxu1 }
 0x1b6   : > { %v1049_v15 = vadd.f32 %v1048_v11, %v959_v10 }
 0x1b7   : > { %1365 = vst [vmem:[%s2400_s28 + $0xd8] sm:$0xff] %v1333_v8  ;;  %v1225_v12 = vadd.f32 %v1224_v7, %v1136_v9 }
 0x1b9   : > { %v1266_v13 = vmul.f32 %v2382_v18, %v1225_v12 }
 0x1bb   : > { %v1302_v14 = vadd.f32 %v2387_v22, %v1266_v13 }
 0x1bc   : > { %v1137_v16 = vpop.f32.mrf.mxu2  ;;  %v962_v21 = vpop.f32.mrf.mxu0 }
 0x1bd   : > { %v1226_v17 = vpop.f32.mrf.mxu3  ;;  %v1334_v19 = vmax.f32 %v1302_v14, 0.0  ;;  %v1138_v20 = vadd.f32 %v1137_v16, %v1049_v15  ;;  %v1051_v23 = vpop.f32.mrf.mxu1 }
 0x1be   : > { %v1052_v26 = vadd.f32 %v1051_v23, %v962_v21 }
 0x1bf   : > { %1366 = vst [vmem:[%s2400_s28 + $0xe0] sm:$0xff] %v1334_v19  ;;  %v1227_v24 = vadd.f32 %v1226_v17, %v1138_v20 }
 0x1c1   : > { %v1267_v25 = vmul.f32 %v2382_v18, %v1227_v24 }
 0x1c3   : > { %v1303_v27 = vadd.f32 %v2387_v22, %v1267_v25 }
 0x1c4   : > { %v1140_v28 = vpop.f32.mrf.mxu2  ;;  %v964_v33 = vpop.f32.mrf.mxu0 }
 0x1c5   : > { %v1229_v29 = vpop.f32.mrf.mxu3  ;;  %v1335_v30 = vmax.f32 %v1303_v27, 0.0  ;;  %v1141_v31 = vadd.f32 %v1140_v28, %v1052_v26  ;;  %v1053_v34 = vpop.f32.mrf.mxu1 }
 0x1c6   : > { %v1054_v37 = vadd.f32 %v1053_v34, %v964_v33 }
 0x1c7   : > { %1367 = vst [vmem:[%s2400_s28 + $0xe8] sm:$0xff] %v1335_v30  ;;  %v1230_v32 = vadd.f32 %v1229_v29, %v1141_v31 }
 0x1c9   : > { %v1268_v35 = vmul.f32 %v2382_v18, %v1230_v32 }
 0x1cb   : > { %v1304_v36 = vadd.f32 %v2387_v22, %v1268_v35 }
 0x1cc   : > { %v1142_v38 = vpop.f32.mrf.mxu2 }
 0x1cd   : > { %v1336_v39 = vmax.f32 %v1304_v36, 0.0  ;;  %v1143_v40 = vadd.f32 %v1142_v38, %v1054_v37  ;;  %v1231_v41 = vpop.f32.mrf.mxu3 }
 0x1cf   : > { %1368 = vst [vmem:[%s2400_s28 + $0xf0] sm:$0xff] %v1336_v39  ;;  %v1232_v42 = vadd.f32 %v1231_v41, %v1143_v40 }
 0x1d1   : > { %v1269_v43 = vmul.f32 %v2382_v18, %v1232_v42 }
 0x1d3   : > { %v1305_v44 = vadd.f32 %v2387_v22, %v1269_v43 }
 0x1d5   : > { %v1337_v45 = vmax.f32 %v1305_v44, 0.0 }
 0x1d7   : > { %1369 = vst [vmem:[%s2400_s28 + $0xf8] sm:$0xff] %v1337_v45 }
 0x1d8   : > { %2121 = shalt.err (!%p2118_p10)
}
 0x1d9   : > { %s2171_s20 = smov 128   ;;  %s2172_s25 = smov 8  }
 0x1da   : > { %1975 = dma.vmem_to_hbm [thread:$0]  (%p2265_p7), %s1384_s13, 4096, %s1386_s10, %s1371_s19, %s2171_s20, %s2171_s20, %s2172_s25  }
 0x1db PF: > { %s1400_s27 = sand.u32 1, %s2152_s15   ;;  %p2588_p12 = scmp.ge.s32.totalorder %s2164_s18, 2 }
 0x1dc   : > { %s1401_s28 = scalar_lea.sflag [#allocation4], %s1400_s27 }
 0x1dd   : > { %p1986_p13 = pnand %p2588_p12, %p2233_p6 }
 0x1df   : > { %p1987_p0 = pneg %p1986_p13 }
 0x1e1   : > { %2147 = dma.done.wait (%p1987_p0), %s1401_s28, 4096  }
 0x1e2   : > { %2149 = vsyncadd (%p1987_p0), %s1401_s28, 4294963200  ;;  %p18_p3 = scmp.ge.s32.totalorder %s2251_s29, 4   ;;  %s2589_s15 = smov %s2156_s16 }
 0x1e3   : > { %s2590_s16 = smov %s2160_s17  ;;  %s2591_s17 = smov %s2261_s8 }
 0x1e4   : > { %s2592_s18 = smov %s2251_s29  ;;  %20 = sbr.rel (!%p18_p3) target bundleno = 6 (0x6), region = 85 }
 0x1e9   :  { %1407 = vsyncpa [#allocation3], 1 }
 0x1ea   :  { %1409 = vsyncpa [#allocation3 + $0x1], 1 }
 0x1eb   :  { %1410 = vsyncpa [#allocation6], 1 }
 0x1ec   :  { %1411 = vsyncpa [#allocation4], 1 }
 0x1ed   :  { %1413 = vsyncpa [#allocation4 + $0x1], 1 }

</bundles_post_ra>
